<compile_context>
chip_gen: v5e
topology: v5e:2x2
jax: 0.10.0
libtpu: 0.0.40
codegen_flags: <defaults>
</compile_context>

<pallas_src>
import jax
import jax.numpy as jnp
from jax.experimental import pallas as pl
from jax.experimental.pallas import tpu as pltpu


def _point_heatmap_kernel(params_ref, x_ref, o_ref):
    # params_ref: SMEM (C + 1,) scalars = [w_0 .. w_{C-1}, bias]
    # x_ref:      VMEM (1, C, TPIX)   pixels-in-lanes input tile
    # o_ref:      VMEM (1, 1, TPIX)   lane-dense heatmap logits tile
    x = x_ref[0]                                 # (C, TPIX)
    c = x.shape[0]
    acc = x[0:1, :] * params_ref[0]              # (1, TPIX) VALU fma chain,
    for ch in range(1, c):                       # statically unrolled over C
        acc = acc + x[ch:ch + 1, :] * params_ref[ch]
    o_ref[0] = acc + params_ref[c]               # + bias, unmasked vst


def _pick_pixel_tile(p, max_tile_pixels):
    """Largest lane-dense tile (multiple of 128) that divides p, capped at budget."""
    if p % 128 != 0:
        return p                      # full-extent pixel block is always legal
    tpix = p
    while tpix > max_tile_pixels and tpix % 256 == 0:
        tpix //= 2                    # stays a multiple of 128 and a divisor of p
    return tpix


def forward_point_heatmap(x_nchw, weight, bias, *, max_tile_pixels=1 << 17):
    """x_nchw: (N, C, H, W) float32. weight: (C,), bias: scalar.
    Returns heatmap of shape (N, 1, H, W)."""
    n, c, h, w = x_nchw.shape
    p = h * w

    # Free (metadata-only) views: NCHW is contiguous, so no HBM transpose.
    x3 = x_nchw.reshape(n, c, p).astype(jnp.float32)

    tpix = _pick_pixel_tile(p, max_tile_pixels)
    grid_p = p // tpix

    # Weights + bias as SMEM scalars (C=4 multipliers + 1 bias).
    params = jnp.concatenate(
        [weight.astype(jnp.float32).reshape(c),
         jnp.asarray(bias, jnp.float32).reshape(1)])

    out = pl.pallas_call(
        _point_heatmap_kernel,
        out_shape=jax.ShapeDtypeStruct((n, 1, p), jnp.float32),
        grid_spec=pltpu.PrefetchScalarGridSpec(
            num_scalar_prefetch=0,
            grid=(n, grid_p),
            in_specs=[
                pl.BlockSpec(memory_space=pltpu.SMEM),                  # params
                pl.BlockSpec((1, c, tpix), lambda i, j: (i, 0, j)),     # pixels
            ],
            out_specs=pl.BlockSpec((1, 1, tpix), lambda i, j: (i, 0, j)),
        ),
        compiler_params=pltpu.CompilerParams(
            dimension_semantics=("parallel", "parallel"),
            vmem_limit_bytes=32 * 1024 * 1024,
        ),
    )(params, x3)

    # (N, 1, P) -> (N, 1, H, W): free reshape, no transpose.
    return out.reshape(n, 1, h, w)


class BaseHeatmapModel:
    """JAX/Pallas counterpart of the PyTorch BaseHeatmapModel."""

    def __init__(self, can_predict=False, can_classify=False, num_channels=4):
        self.can_predict = can_predict
        self.can_classify = can_classify
        # Deterministic synthetic parameters for the point-heatmap head (1x1 conv C->1).
        key = jax.random.PRNGKey(0)
        kw, kb = jax.random.split(key)
        self.weight = jax.random.normal(kw, (num_channels,), jnp.float32) * 0.1
        self.bias = jax.random.normal(kb, (), jnp.float32) * 0.1

    def forward_point_heatmap(self, x):
        return forward_point_heatmap(x, self.weight, self.bias)

    def forward_class_heatmaps(self, x):
        # TODO(synk): abstract in the reference module (raises NotImplementedError).
        raise NotImplementedError

    def forward_class_downscale_heatmaps(self, x):
        # TODO(synk): abstract in the reference module (raises NotImplementedError).
        raise NotImplementedError

    def forward(self, x):
        return self.forward_point_heatmap(x)

    def __call__(self, x):
        return self.forward(x)

    def freeze_batchnorm(self):
        # No-op: JAX params are functional; BatchNorm/Dropout eval-mode toggling
        # has no forward-time compute to kernelize.
        pass


if __name__ == "__main__":
    key = jax.random.PRNGKey(0)
    n, c, h, w = 2, 4, 16, 16
    x = jax.random.normal(key, (n, c, h, w), jnp.float32)

    model = BaseHeatmapModel(num_channels=c)
    out = model(x)
    out = jax.block_until_ready(out)

    # Cross-check against a plain-JAX reference of the same 1x1-conv head.
    ref = jnp.einsum("nchw,c->nhw", x, model.weight)[:, None, :, :] + model.bias
    assert out.shape == (n, 1, h, w), out.shape
    assert jnp.allclose(out, ref, atol=1e-5, rtol=1e-5)

    print("KERNEL_OK")
</pallas_src>

<mosaic_0001>
module attributes {stable_mosaic.version = 11 : i64} {
  func.func @_point_heatmap_kernel(%arg0: i32, %arg1: i32, %arg2: memref<5xf32, #tpu.memory_space<smem>>, %arg3: memref<1x4x256xf32, #tpu.memory_space<vmem>>, %arg4: memref<1x1x256xf32, #tpu.memory_space<vmem>>) attributes {dimension_semantics = [#tpu.dimension_semantics<parallel>, #tpu.dimension_semantics<parallel>], iteration_bounds = array<i64: 2, 1>, scalar_prefetch = 0 : i64, scratch_operands = 0 : i64, tpu.core_type = #tpu.core_type<tc>, window_params = [{transform_indices = @transform_0, window_bounds = array<i64: 5>}, {transform_indices = @transform_1, window_bounds = array<i64: 1, 4, 256>}, {transform_indices = @transform_2, window_bounds = array<i64: 1, 1, 256>}]} {
    %c0 = arith.constant 0 : index
    %c0_0 = arith.constant 0 : index
    %c0_1 = arith.constant 0 : index
    %0 = vector.load %arg3[%c0, %c0_0, %c0_1] : memref<1x4x256xf32, #tpu.memory_space<vmem>>, vector<1x4x256xf32>
    %1 = vector.shape_cast %0 : vector<1x4x256xf32> to vector<4x256xf32>
    %2 = vector.extract_strided_slice %1 {offsets = [0, 0], sizes = [1, 256], strides = [1, 1]} : vector<4x256xf32> to vector<1x256xf32>
    %c0_2 = arith.constant 0 : index
    %3 = memref.load %arg2[%c0_2] : memref<5xf32, #tpu.memory_space<smem>>
    %4 = vector.broadcast %3 : f32 to vector<1x256xf32>
    %5 = arith.mulf %2, %4 : vector<1x256xf32>
    %6 = vector.extract_strided_slice %1 {offsets = [1, 0], sizes = [1, 256], strides = [1, 1]} : vector<4x256xf32> to vector<1x256xf32>
    %c1 = arith.constant 1 : index
    %7 = memref.load %arg2[%c1] : memref<5xf32, #tpu.memory_space<smem>>
    %8 = vector.broadcast %7 : f32 to vector<1x256xf32>
    %9 = arith.mulf %6, %8 : vector<1x256xf32>
    %10 = arith.addf %5, %9 : vector<1x256xf32>
    %11 = vector.extract_strided_slice %1 {offsets = [2, 0], sizes = [1, 256], strides = [1, 1]} : vector<4x256xf32> to vector<1x256xf32>
    %c2 = arith.constant 2 : index
    %12 = memref.load %arg2[%c2] : memref<5xf32, #tpu.memory_space<smem>>
    %13 = vector.broadcast %12 : f32 to vector<1x256xf32>
    %14 = arith.mulf %11, %13 : vector<1x256xf32>
    %15 = arith.addf %10, %14 : vector<1x256xf32>
    %16 = vector.extract_strided_slice %1 {offsets = [3, 0], sizes = [1, 256], strides = [1, 1]} : vector<4x256xf32> to vector<1x256xf32>
    %c3 = arith.constant 3 : index
    %17 = memref.load %arg2[%c3] : memref<5xf32, #tpu.memory_space<smem>>
    %18 = vector.broadcast %17 : f32 to vector<1x256xf32>
    %19 = arith.mulf %16, %18 : vector<1x256xf32>
    %20 = arith.addf %15, %19 : vector<1x256xf32>
    %c4 = arith.constant 4 : index
    %21 = memref.load %arg2[%c4] : memref<5xf32, #tpu.memory_space<smem>>
    %22 = vector.broadcast %21 : f32 to vector<1x256xf32>
    %23 = arith.addf %20, %22 : vector<1x256xf32>
    %c0_3 = arith.constant 0 : index
    %c0_4 = arith.constant 0 : index
    %c0_5 = arith.constant 0 : index
    %24 = vector.load %arg4[%c0_3, %c0_4, %c0_5] : memref<1x1x256xf32, #tpu.memory_space<vmem>>, vector<1x1x256xf32>
    %25 = vector.shape_cast %24 : vector<1x1x256xf32> to vector<1x256xf32>
    %26 = vector.shape_cast %23 : vector<1x256xf32> to vector<1x1x256xf32>
    tpu.vector_store %arg4[%c0_3, %c0_4, %c0_5], %26 {strides = array<i32>} : memref<1x1x256xf32, #tpu.memory_space<vmem>>, vector<1x1x256xf32>,
    return
  }
  func.func @transform_0(%arg0: i32, %arg1: i32) -> i32 {
    %c0_i32 = arith.constant 0 : i32
    %c0_i32_0 = arith.constant 0 : i32
    return %c0_i32 : i32
  }
  func.func @transform_1(%arg0: i32, %arg1: i32) -> (i32, i32, i32) {
    %c0_i32 = arith.constant 0 : i32
    %c0_i32_0 = arith.constant 0 : i32
    return %arg0, %c0_i32, %arg1 : i32, i32, i32
  }
  func.func @transform_2(%arg0: i32, %arg1: i32) -> (i32, i32, i32) {
    %c0_i32 = arith.constant 0 : i32
    %c0_i32_0 = arith.constant 0 : i32
    return %arg0, %c0_i32, %arg1 : i32, i32, i32
  }
}

</mosaic_0001>

<bundles_post_ra>
// kernel: tpu_custom_call.1
= control target key start
LH: loop header
LB: loop body
LE: loop exit
PB: predicated region body
PF: predicated region fallthrough
CT: control target
= control target key end

     0   :  { %7 = vsyncpa [#allocation5], 0  ;;  %s742_s0 = inlined_call_operand.hbm [shape: f32[5], index: 0, kind: input, shape index: {}]   ;;  %s743_s1 = inlined_call_operand.hbm [shape: f32[2,4,256], index: 1, kind: input, shape index: {}]   ;;  %s744_s2 = inlined_call_operand.hbm [shape: f32[2,1,256], index: 2, kind: output, shape index: {}]  }
   0x1   :  { %8 = vsyncpa [#allocation3], 0 }
   0x2   :  { %10 = vsyncpa [#allocation3 + $0x1], 0 }
   0x3   :  { %11 = vsyncpa [#allocation4], 0 }
   0x4   :  { %13 = vsyncpa [#allocation4 + $0x1], 0  ;;  %s596_s9 = smov 0   ;;  %s598_s10 = smov 0  }
   0x5   :  { %s600_s11 = smov 0   ;;  %s602_s12 = smov 0  }
   0x6   :  { %s604_s13 = smov 0   ;;  %s606_s14 = smov 0  }
   0x7 LB: > { %s350_s15 = sadd.s32 4294967295, %s578_s14   ;;  %s351_s16 = sadd.s32 4294967294, %s578_s14   ;;  %s578_s14 = sphi %s606_s14, %s19_s14   ;;  %s574_s13 = sphi %s604_s13, %s756_s13   ;;  %s570_s12 = sphi %s602_s12, %s755_s12   ;;  %s566_s11 = sphi %s600_s11, %s754_s11   ;;  %s562_s10 = sphi %s598_s10, %s753_s10   ;;  %s558_s9 = sphi %s596_s9, %s752_s9  }
   0x8   : > { %p74_p0 = scmp.ne.s32.totalorder %s562_s10, %s558_s9  ;;  %p630_p1 = scmp.eq.s32.totalorder %s350_s15, 0 }
   0x9   : > { %p634_p2 = scmp.eq.s32.totalorder %s350_s15, 1  ;;  %p106_p3 = scmp.eq.s32.totalorder %s351_s16, 1 }
   0xa   : > { %p640_p4 = por %p630_p1, %p74_p0  ;;  %p352_p5 = scmp.ge.s32.totalorder %s578_s14, 1 }
   0xb   : > { %p645_p6 = por %p106_p3, %p74_p0  ;;  %p113_p7 = scmp.lt.s32.totalorder %s578_s14, 3 }
   0xc   : > { %s125_s23 = sshll.u32 %s742_s0, 4  ;;  %s31_s25 = sadd.s32 1, %s574_s13  ;;  %s126_s23 = int_to_ptr.hbm [resolvable:$true] %s125_s23 }
   0xd   : > { %p653_p8 = pnand %p352_p5, %p113_p7  ;;  %s61_s26 = sadd.s32 1, %s566_s11 }
   0xe   : > { %p33_p12 = scmp.ge.s32.totalorder %s31_s25, 2  ;;  %s580_s27 = smov [#allocation2]  }
   0xf   : > { %p382_p10 = pneg %p653_p8  ;;  %p68_p13 = scmp.ne.s32.totalorder %s566_s11, %s562_s10 }
  0x10   : > { %s758_s25 = smov (%p33_p12, %s31_s25), 0  ;;  %p69_p0 = scmp.eq.s32.totalorder %s578_s14, 0 }
  0x11   : > { %p383_p11 = pnand %p382_p10, %p630_p1  ;;  %s56_s28 = ssub.s32 %s574_s13, %s758_s25 }
  0x12   : > { %p395_p3 = scmp.lt.s32.totalorder %s578_s14, 2  ;;  %p59_p5 = scmp.eq.s32.totalorder %s56_s28, 0 }
  0x13   : > { %385 = dma.hbm_to_smem (!%p383_p11), %s126_s23, 16, %s580_s27, [#allocation5]  }
  0x14   : > { %p70_p7 = por %p69_p0, %p68_p13  ;;  %p674_p9 = por %p634_p2, %p68_p13 }
  0x15   : > { %s136_s30 = sand.u32 1, %s566_s11   ;;  %s373_s5 = sshll.u32 %s574_s13, 3 }
  0x16   : > { %s680_s3 = scalar_select %p59_p5, %s566_s11, %s61_s26  }
  0x17   : > { %s355_s4 = sshll.u32 %s136_s30, 3  ;;  %s147_s8 = scalar_lea.hbm %s743_s1, %s373_s5 }
  0x18   : > { %s140_s15 = scalar_lea.vmem [#allocation6], %s355_s4  ;;  %s149_s21 = sshll.u32 %s147_s8, 4  ;;  %s150_s21 = int_to_ptr.hbm [resolvable:$true] %s149_s21 }
  0x19   : > { %s151_s16 = sshll.u32 %s140_s15, 4  ;;  %p387_p10 = pnand %p395_p3, %p70_p7  ;;  %s152_s16 = int_to_ptr.vmem [resolvable:$true] %s151_s16 }
  0x1a   : > { %s137_s18 = scalar_lea.sflag [#allocation3], %s136_s30  ;;  %160 = sbr.rel (%p653_p8) target bundleno = 64 (0x40), region = 28 }
  0x1b   : > { %389 = dma.hbm_to_vmem [thread:$0]  (!%p387_p10), %s150_s21, 128, %s152_s16, %s137_s18  }
  0x1f   : > { %545 = dma.done.wait (%p630_p1), [#allocation5], 16  }
  0x20   : > { %547 = vsyncadd (%p630_p1), [#allocation5], 4294967280  ;;  %s695_s22 = sand.u32 1, %s562_s10  }
  0x21   : > { %s360_s23 = sshll.u32 %s695_s22, 3  ;;  %s168_s26 = scalar_lea.sflag [#allocation3], %s695_s22 }
  0x22   : > { %s171_s27 = scalar_lea.vmem [#allocation6], %s360_s23 }
  0x23   : > { %549 = dma.done.wait (%p640_p4), %s168_s26, 128  }
  0x24   : > { %551 = vsyncadd (%p640_p4), %s168_s26, 4294967168 }
  0x25   : > { %177 = sfence }
  0x26   : > { %s197_s24 = sld [smem:[#allocation2]]  ;;  %v196_v0 = vld [vmem:[%s171_s27] sm:$0xff]  ;;  %s361_s19 = sshll.u32 %s695_s22, 1  ;;  %v232_v16 = vlaneseq  ;;  %vm229_vm0 = vcmask 1040384  }
  0x27   : > { %s362_s28 = sld [smem:[#allocation2 + $0x1]]  ;;  %s370_s5 = sshll.u32 %s570_s12, 1 }
  0x28   : > { %s364_s17 = sld [smem:[#allocation2 + $0x2]]  ;;  %s250_s8 = scalar_lea.hbm %s744_s2, %s370_s5  ;;  %vm234_vm1 = vcmp.lt.s32.totalorder %v232_v16, 256 }
  0x29   : > { %s366_s30 = sld [smem:[#allocation2 + $0x3]]  ;;  %s193_s15 = scalar_lea.vmem [#allocation7], %s361_s19 }
  0x2a   : > { %s368_s4 = sld [smem:[#allocation2 + $0x4]]  ;;  %s252_s16 = sshll.u32 %s193_s15, 4  ;;  %s253_s16 = int_to_ptr.vmem [resolvable:$true] %s252_s16 }
  0x2b   : > { %s254_s21 = sshll.u32 %s250_s8, 4  ;;  %s238_s12 = scalar_lea.sflag [#allocation4], %s695_s22  ;;  %s255_s21 = int_to_ptr.hbm [resolvable:$true] %s254_s21 }
  0x2c   : > { %v198_v1 = vstv %s197_s24  ;;  %s506_s18 = sshra.s32 %s255_s21, 4  ;;  %s512_s24 = scalar_lea.hbm %s744_s2, 4  ;;  %s507_s18 = int_to_ptr.hbm [resolvable:$true] %s506_s18 }
  0x2d   : > { %v201_v2 = vstv %s362_s28  ;;  %v199_v3 = vmul.f32 %v198_v1, %v196_v0  ;;  %s508_s23 = scalar_lea.hbm %s507_s18, 2  ;;  %p513_p8 = scmp.lt.s32.totalorder %s507_s18, %s744_s2 }
  0x2e   : > { %v202_v4 = vmul.f32 %v201_v2, %v196_v0  ;;  %v209_v5 = vstv %s364_s17  ;;  %p509_p1 = scmp.ne.s32.totalorder %s507_s18, %s508_s23  ;;  %p514_p11 = scmp.lt.s32.totalorder %s512_s24, %s508_s23 }
  0x2f   : > { %v210_v6 = vmul.f32 %v209_v5, %v196_v0  ;;  %v217_v7 = vstv %s366_s30 }
  0x30   : > { %v363_v8 = vrot.slane %v202_v4, 9  ;;  %v218_v9 = vmul.f32 %v217_v7, %v196_v0  ;;  %v225_v14 = vstv %s368_s4  ;;  %p510_p2 = pnand %p509_p1, %p674_p9  ;;  %p515_p12 = por %p514_p11, %p513_p8 }
  0x31   : > { %v365_v10 = vrot.slane %v210_v6, 10 }
  0x32   : > { %v207_v11 = vadd.f32 %v363_v8, %v199_v3  ;;  %v367_v12 = vrot.slane %v218_v9, 11  ;;  %p511_p4 = pneg %p510_p2 }
  0x34   : > { %v215_v13 = vadd.f32 %v365_v10, %v207_v11  ;;  %p516_p13 = pnand %p515_p12, %p511_p4 }
  0x36   : > { %v223_v15 = vadd.f32 %v367_v12, %v215_v13 }
  0x38   : > { %v226_v17 = vadd.f32 %v225_v14, %v223_v15 }
  0x3a   : > { %v228_v18 = vrot.slane %v226_v17, 3 }
  0x3c   : > { %v230_v19 = vsel %vm229_vm0, %v226_v17, %v228_v18 }
  0x3d   : > { %236 = vst.msk [vmem:[%s193_s15] sm:$0x3] %vm234_vm1, %v230_v19 }
  0x3e   : > { %519 = shalt.err (!%p516_p13)
}
  0x3f   : > { %380 = dma.vmem_to_hbm [thread:$0]  (%p674_p9), %s253_s16, 32, %s255_s21, %s238_s12  }
  0x40 PF: > { %s266_s22 = sand.u32 1, %s558_s9   ;;  %p751_p0 = scmp.ge.s32.totalorder %s578_s14, 2 }
  0x41   : > { %s267_s30 = scalar_lea.sflag [#allocation4], %s266_s22 }
  0x42   : > { %p391_p3 = pnand %p751_p0, %p645_p6 }
  0x44   : > { %p392_p5 = pneg %p391_p3 }
  0x46   : > { %553 = dma.done.wait (%p392_p5), %s267_s30, 32  }
  0x47   : > { %555 = vsyncadd (%p392_p5), %s267_s30, 4294967264  ;;  %s19_s14 = sadd.s32 1, %s578_s14   ;;  %s752_s9 = smov %s562_s10 }
  0x48   : > { %p16_p7 = scmp.ge.s32.totalorder %s19_s14, 4   ;;  %s753_s10 = smov %s566_s11 }
  0x49   : > { %s754_s11 = smov %s680_s3  ;;  %s755_s12 = smov %s574_s13 }
  0x4a   : > { %s756_s13 = smov %s758_s25  ;;  %18 = sbr.rel (!%p16_p7) target bundleno = 7 (0x7), region = 78 }
  0x4f   :  { %273 = vsyncpa [#allocation3], 1 }
  0x50   :  { %275 = vsyncpa [#allocation3 + $0x1], 1 }
  0x51   :  { %276 = vsyncpa [#allocation4], 1 }
  0x52   :  { %278 = vsyncpa [#allocation4 + $0x1], 1 }
  0x53   :  { %279 = vsyncpa [#allocation5], 1 }
  0x54   :  { %281 = vsyncpa [#allocation5 + $0x1], 1 }

</bundles_post_ra>
